<compile_context>
chip_gen: v7x
topology: tpu7x:2x2x1
jax: 0.10.0
libtpu: 0.0.40
codegen_flags: <defaults>
</compile_context>

<pallas_src>
import functools
import math

import jax
import jax.numpy as jnp
from jax.experimental import pallas as pl
from jax.experimental.pallas import tpu as pltpu


_PER_INPUT_BUFFER_BYTES = 16 * 1024 * 1024   # per input buffer (double-buffered -> 32 MiB)
_VMEM_LIMIT_BYTES = 48 * 1024 * 1024         # fits v7x 64 MiB; well under v5e/v6e 128 MiB


def _round_up(x, m):
    return ((x + m - 1) // m) * m


def _cdiv(a, b):
    return -(-a // b)


def gem_kernel(p_ref, x_ref, o_ref, *, eps, hw):
    # p_ref: SMEM scalar-prefetch ref, shape (1,): learnable exponent p.
    # x_ref: VMEM tile of shape (TILE_R, hw).
    # o_ref: VMEM tile of shape (1, 1, TILE_R) -- lane-dense output row.
    p = p_ref[0]
    inv_p = 1.0 / p

    x = x_ref[...].astype(jnp.float32)
    xc = jnp.maximum(x, jnp.float32(eps))        # clamp(min=eps) -> strictly positive
    # x^p == exp(p * log(x)) exactly for x >= eps > 0; avoids generic-pow's
    # compare/select chains (VALU/vreg pressure). Transcendental count unchanged.
    xp = jnp.exp(p * jnp.log(xc))
    s = jnp.sum(xp, axis=-1)                     # (TILE_R,) sum over true H*W

    # Mean and 1/p root folded into one log/exp per row:
    #   (s / hw)^(1/p) = exp((log(s) - log(hw)) / p)
    out = jnp.exp(inv_p * (jnp.log(s) - jnp.float32(math.log(hw))))

    # Lane-dense store (TILE_R results per vst instead of 1-wide masked stores).
    o_ref[...] = out.reshape(1, 1, -1).astype(o_ref.dtype)


def gem_kernel_static_p(x_ref, o_ref, *, eps, hw, p_int):
    # Frozen-p fast path: x^p with repeated multiplies (VPU only); the 1/p
    # root costs one log/exp per ROW (negligible), not per element.
    x = x_ref[...].astype(jnp.float32)
    xc = jnp.maximum(x, jnp.float32(eps))

    # Exponentiation by squaring, unrolled at trace time.
    acc = None
    base = xc
    e = int(p_int)
    while e > 0:
        if e & 1:
            acc = base if acc is None else acc * base
        e >>= 1
        if e:
            base = base * base

    s = jnp.sum(acc, axis=-1)                    # (TILE_R,)
    out = jnp.exp((jnp.log(s) - jnp.float32(math.log(hw))) / jnp.float32(p_int))
    o_ref[...] = out.reshape(1, 1, -1).astype(o_ref.dtype)


def _row_tile(rows, hw, itemsize):
    # VMEM footprint of one row (lanes pad to 128 inside the tile).
    bytes_per_row = _round_up(hw, 128) * itemsize
    tile_r = (_PER_INPUT_BUFFER_BYTES // bytes_per_row // 8) * 8
    tile_r = max(8, tile_r)
    # Keep num_tiles >= 2 whenever possible so both v7x TensorCores get work
    # (the "parallel" grid axis is megacore-sharded).
    half_rows = _round_up(max(1, _cdiv(rows, 2)), 8)
    return min(tile_r, max(8, half_rows))


def gem(x, p=None, eps=1e-6, static_p=None):
    """GeM pooling. x: (N, C, H, W); p: (1,) learnable exponent. -> (N, C, 1, 1).

    If static_p is given (small positive int, e.g. frozen p=3 at inference),
    a transcendental-free elementwise path is used and `p` is ignored.
    """
    N, C, H, W = x.shape
    rows, hw = N * C, H * W
    xr = x.reshape(rows, hw)

    itemsize = jnp.dtype(x.dtype).itemsize
    tile_r = _row_tile(rows, hw, itemsize)
    num_tiles = _cdiv(rows, tile_r)              # ragged tail handled in-kernel, no jnp.pad

    per_elem_transc = 0 if static_p is not None else 2
    cost = pl.CostEstimate(
        flops=3 * rows * hw,
        transcendentals=per_elem_transc * rows * hw + 2 * rows,
        bytes_accessed=rows * hw * itemsize + rows * itemsize,
    )
    cparams = pltpu.CompilerParams(
        dimension_semantics=("parallel",),        # megacore-shard row tiles
        vmem_limit_bytes=_VMEM_LIMIT_BYTES,
    )
    # Output is (num_tiles, 1, tile_r): last two dims of each block equal the
    # full array dims, so the (8, 128) block constraint is satisfied for any
    # tile_r, and the stored row is lane-dense.
    out_shape = jax.ShapeDtypeStruct((num_tiles, 1, tile_r), x.dtype)

    if static_p is not None:
        out = pl.pallas_call(
            functools.partial(gem_kernel_static_p, eps=eps, hw=hw, p_int=int(static_p)),
            out_shape=out_shape,
            grid_spec=pltpu.PrefetchScalarGridSpec(
                num_scalar_prefetch=0,
                grid=(num_tiles,),
                in_specs=[pl.BlockSpec((tile_r, hw), lambda i: (i, 0))],
                out_specs=pl.BlockSpec((1, 1, tile_r), lambda i: (i, 0, 0)),
            ),
            compiler_params=cparams,
            cost_estimate=cost,
        )(xr)
    else:
        out = pl.pallas_call(
            functools.partial(gem_kernel, eps=eps, hw=hw),
            out_shape=out_shape,
            grid_spec=pltpu.PrefetchScalarGridSpec(
                num_scalar_prefetch=1,            # p goes to SMEM
                grid=(num_tiles,),
                in_specs=[pl.BlockSpec((tile_r, hw), lambda i, p_ref: (i, 0))],
                out_specs=pl.BlockSpec((1, 1, tile_r), lambda i, p_ref: (i, 0, 0)),
            ),
            compiler_params=cparams,
            cost_estimate=cost,
        )(p.astype(jnp.float32).reshape(1), xr)

    # Tail rows of the last (partial) tile are garbage and are discarded here.
    return out.reshape(-1)[:rows].reshape(N, C, 1, 1)


if __name__ == "__main__":
    key = jax.random.PRNGKey(0)
    k1, k2 = jax.random.split(key)
    eps = 1e-6

    # Parameter init exactly as in the PyTorch module: p = ones(1) * 3
    p = jnp.ones((1,), dtype=jnp.float32) * 3.0

    def ref_gem(x, pval, eps):
        return jnp.power(
            jnp.mean(jnp.power(jnp.maximum(x, eps), pval), axis=(-2, -1), keepdims=True),
            1.0 / pval,
        )

    # Test 1: lane-aligned spatial (16x16 -> hw=256), learnable-p path.
    x1 = jax.random.normal(k1, (2, 4, 16, 16), dtype=jnp.float32)
    y1 = jax.block_until_ready(gem(x1, p, eps=eps))
    r1 = ref_gem(x1, p[0], eps)
    assert y1.shape == (2, 4, 1, 1), y1.shape
    assert jnp.allclose(y1, r1, rtol=3e-5, atol=1e-6), float(jnp.max(jnp.abs(y1 - r1)))

    # Test 2: ragged row count (15 rows -> partial tail block, no jnp.pad) and
    # classic GeM 7x7 spatial (hw=49).
    x2 = jax.random.normal(k2, (3, 5, 7, 7), dtype=jnp.float32)
    y2 = jax.block_until_ready(gem(x2, p, eps=eps))
    r2 = ref_gem(x2, p[0], eps)
    assert y2.shape == (3, 5, 1, 1), y2.shape
    assert jnp.allclose(y2, r2, rtol=3e-5, atol=1e-6), float(jnp.max(jnp.abs(y2 - r2)))

    # Test 3: frozen-p fast path (repeated multiplies, no per-element transcendentals).
    y3 = jax.block_until_ready(gem(x1, eps=eps, static_p=3))
    assert jnp.allclose(y3, r1, rtol=3e-5, atol=1e-6), float(jnp.max(jnp.abs(y3 - r1)))

    print("KERNEL_OK")
</pallas_src>

<mosaic_0001>
module attributes {stable_mosaic.version = 11 : i64} {
  func.func @gem_kernel(%arg0: i32, %arg1: memref<1xf32, #tpu.memory_space<smem>>, %arg2: memref<8x256xf32, #tpu.memory_space<vmem>>, %arg3: memref<1x1x8xf32, #tpu.memory_space<vmem>>) attributes {dimension_semantics = [#tpu.dimension_semantics<parallel>], iteration_bounds = array<i64: 1>, scalar_prefetch = 1 : i64, scratch_operands = 0 : i64, tpu.core_type = #tpu.core_type<tc>, window_params = [{transform_indices = @transform_0, window_bounds = array<i64: 8, 256>}, {transform_indices = @transform_1, window_bounds = array<i64: 1, 1, 8>}]} {
    %c0 = arith.constant 0 : index
    %0 = memref.load %arg1[%c0] : memref<1xf32, #tpu.memory_space<smem>>
    %cst = arith.constant 1.000000e+00 : f32
    %1 = arith.divf %cst, %0 : f32
    %c0_0 = arith.constant 0 : index
    %c0_1 = arith.constant 0 : index
    %2 = vector.load %arg2[%c0_0, %c0_1] : memref<8x256xf32, #tpu.memory_space<vmem>>, vector<8x256xf32>
    %cst_2 = arith.constant 9.99999997E-7 : f32
    %3 = vector.broadcast %cst_2 : f32 to vector<8x256xf32>
    %4 = arith.maximumf %2, %3 : vector<8x256xf32>
    %5 = math.log %4 : vector<8x256xf32>
    %6 = vector.broadcast %0 : f32 to vector<8x256xf32>
    %7 = arith.mulf %6, %5 : vector<8x256xf32>
    %8 = math.exp %7 : vector<8x256xf32>
    %cst_3 = arith.constant dense<0.000000e+00> : vector<8xf32>
    %9 = vector.multi_reduction <add>, %8, %cst_3 [1] : vector<8x256xf32> to vector<8xf32>
    %10 = math.log %9 : vector<8xf32>
    %cst_4 = arith.constant 5.54517746 : f32
    %11 = vector.broadcast %cst_4 : f32 to vector<8xf32>
    %12 = arith.subf %10, %11 : vector<8xf32>
    %13 = vector.broadcast %1 : f32 to vector<8xf32>
    %14 = arith.mulf %13, %12 : vector<8xf32>
    %15 = math.exp %14 : vector<8xf32>
    %16 = vector.shape_cast %15 : vector<8xf32> to vector<1x1x8xf32>
    %c0_5 = arith.constant 0 : index
    %c0_6 = arith.constant 0 : index
    %c0_7 = arith.constant 0 : index
    %17 = vector.load %arg3[%c0_5, %c0_6, %c0_7] : memref<1x1x8xf32, #tpu.memory_space<vmem>>, vector<1x1x8xf32>
    tpu.vector_store %arg3[%c0_5, %c0_6, %c0_7], %16 {strides = array<i32>} : memref<1x1x8xf32, #tpu.memory_space<vmem>>, vector<1x1x8xf32>,
    return
  }
  func.func @transform_0(%arg0: i32, %arg1: memref<1xf32, #tpu.memory_space<smem>>) -> (i32, i32) {
    %c0_i32 = arith.constant 0 : i32
    %c0_i32_0 = arith.constant 0 : i32
    return %arg0, %c0_i32 : i32, i32
  }
  func.func @transform_1(%arg0: i32, %arg1: memref<1xf32, #tpu.memory_space<smem>>) -> (i32, i32, i32) {
    %c0_i32 = arith.constant 0 : i32
    %c0_i32_0 = arith.constant 0 : i32
    %c0_i32_1 = arith.constant 0 : i32
    return %arg0, %c0_i32, %c0_i32_0 : i32, i32, i32
  }
}

</mosaic_0001>

<bundles_post_ra>
// kernel: tpu_custom_call.1
= control target key start
LH: loop header
LB: loop body
LE: loop exit
PB: predicated region body
PF: predicated region fallthrough
CT: control target
= control target key end

     0   :  { %8 = vsyncpa [#allocation5], 0  ;;  %s188_s0 = inlined_call_operand.<no memory space> [shape: f32[1], index: 0, kind: input, shape index: {}]   ;;  %s189_s1 = inlined_call_operand.hbm [shape: f32[8,256], index: 1, kind: input, shape index: {}]   ;;  %s190_s2 = inlined_call_operand.hbm [shape: f32[1,1,8], index: 2, kind: output, shape index: {}]  }
   0x1   :  { %9 = vsyncpa [#allocation6], 0  ;;  %s144_s9 = smov [#allocation4]   ;;  %s96_s13 = scalar_lea.hbm %s189_s1, 256 }
   0x2   :  { %s16_s10 = sshll.u32 %s144_s9, 4  ;;  %p97_p0 = scmp.ne.s32.totalorder %s189_s1, %s96_s13  ;;  %s17_s10 = int_to_ptr.vmem [resolvable:$true] %s16_s10 }
   0x3   :  { %p100_p1 = scmp.lt.u32.totalorder %s96_s13, %s189_s1 }
   0x5   :  { %p102_p2 = pnand %p100_p1, %p97_p0 }
   0x7   :  { %105 = shalt.err (!%p102_p2)
}
   0x8   :  { %s106_s18 = scalar_lea.vmem %s17_s10, 256  ;;  %p111_p4 = scmp.lt.s32.totalorder %s17_s10, %s17_s10 }
   0x9   :  { %p107_p3 = scmp.ne.s32.totalorder %s17_s10, %s106_s18  ;;  %p112_p5 = scmp.lt.s32.totalorder %s106_s18, %s106_s18 }
   0xb   :  { %p113_p6 = por %p112_p5, %p111_p4 }
   0xd   :  { %p114_p7 = pnand %p113_p6, %p107_p3 }
   0xf   :  { %117 = shalt.err (!%p114_p7)
}
  0x10   :  { %19 = dma.hbm_to_vmem [thread:$0]  %s189_s1, 256, %s17_s10, [#allocation5]  }
  0x11   :  { %140 = dma.done.wait [#allocation5], 256  }
  0x12   :  { %141 = vsyncadd [#allocation5], 4294967040  ;;  %v24_v0 = vstv %s188_s0  ;;  %v27_v1 = vld [vmem:[#allocation4] sm:$0xff]  ;;  %v28_v2 = vld [vmem:[#allocation4 + $0x8] sm:$0xff]  ;;  %v53_v24 = vlaneseq  ;;  %s145_s1 = smov [#allocation7]   ;;  %vm60_vm0 = vcmask 57344  }
  0x13   :  { %82 = vrcp.f32 %v24_v0  ;;  %v29_v3 = vmax.f32 %v27_v1, 1e-06  ;;  %v30_v4 = vmax.f32 %v28_v2, 1e-06  ;;  %s68_s23 = sshll.u32 %s145_s1, 4  ;;  %s69_s23 = int_to_ptr.vmem [resolvable:$true] %s68_s23 }
  0x14   :  { %v54_v25 = vand.u32 127, %v53_v24  ;;  %v56_v26 = vshrl.u32 %v53_v24, 7  ;;  %s118_s24 = scalar_lea.vmem %s69_s23, 16  ;;  %s122_s25 = scalar_lea.vmem %s69_s23, 32 }
  0x15   :  { %84 = vlog2.f32 %v29_v3  ;;  %p119_p8 = scmp.ne.s32.totalorder %s69_s23, %s118_s24  ;;  %p123_p9 = scmp.lt.s32.totalorder %s69_s23, %s69_s23 }
  0x16   :  { %86 = vlog2.f32 %v30_v4  ;;  %v57_v27 = vsub.s32 %v54_v25, %v56_v26  ;;  %p124_p10 = scmp.lt.s32.totalorder %s122_s25, %s118_s24 }
  0x18   :  { %p125_p11 = por %p124_p10, %p123_p9 }
  0x1a   :  { %p126_p12 = pnand %p125_p11, %p119_p8 }
  0x1d   :  { %v83_v5 = vpop.eup %82 }
  0x1e   :  { %78 = vpush %v83_v5 }
  0x1f   :  { %v85_v6 = vpop.eup %84 }
  0x20   :  { %v87_v7 = vpop.eup %86  ;;  %v32_v8 = vmul.f32 0.6931472, %v85_v6 }
  0x21   :  { %v34_v9 = vmul.f32 0.6931472, %v87_v7 }
  0x22   :  { %v36_v10 = vmul.f32 %v32_v8, %v24_v0 }
  0x23   :  { %v37_v11 = vmul.f32 %v34_v9, %v24_v0 }
  0x24   :  { %v38_v12 = vmul.f32 1.442695, %v36_v10 }
  0x25   :  { %v40_v13 = vmul.f32 1.442695, %v37_v11 }
  0x26   :  { %88 = vpow2.f32 %v38_v12 }
  0x27   :  { %90 = vpow2.f32 %v40_v13 }
  0x30   :  { %v89_v14 = vpop.eup %88 }
  0x31   :  { %v91_v15 = vpop.eup %90 }
  0x32   :  { %v42_v16 = vadd.f32 %v91_v15, %v89_v14 }
  0x34   :  { %43 = vadd.xlane.f32.xlu0 %v42_v16 }
  0x4f   :  { %s79_s0 = spop %78 }
  0x50   :  { %v48_v20 = vstv %s79_s0 }
  0xc1   :  { %v44_v17 = vpop.xlane.xlu0 %43 }
  0xc2   :  { %92 = vlog2.f32 %v44_v17 }
  0xcc   :  { %v93_v18 = vpop.eup %92 }
  0xcd   :  { %v46_v19 = vmul.f32 0.6931472, %v93_v18 }
  0xcf   :  { %v77_v21 = vadd.f32 -5.5451775, %v46_v19 }
  0xd1   :  { %v49_v22 = vmul.f32 %v77_v21, %v48_v20 }
  0xd3   :  { %v50_v23 = vmul.f32 1.442695, %v49_v22 }
  0xd5   :  { %94 = vpow2.f32 %v50_v23 }
  0xdf   :  { %v95_v28 = vpop.eup %94 }
  0xe0   :  { %v58_v29 = vrot.slane %v95_v28, %v57_v27 }
  0xe2   :  { %61 = vst.msk [vmem:[#allocation7] sm:$0x1] %vm60_vm0, %v58_v29 }
  0xe3   :  { %129 = shalt.err (!%p126_p12)
}
  0xe4   :  { %s130_s28 = scalar_lea.hbm %s190_s2, 16 }
  0xe5   :  { %p131_p13 = scmp.ne.s32.totalorder %s190_s2, %s130_s28  ;;  %p134_p0 = scmp.lt.u32.totalorder %s130_s28, %s190_s2 }
  0xe7   :  { %p136_p1 = pnand %p134_p0, %p131_p13 }
  0xe9   :  { %139 = shalt.err (!%p136_p1)
}
  0xea   :  { %71 = dma.vmem_to_hbm [thread:$0]  %s69_s23, 16, %s190_s2, [#allocation6]  }
  0xeb   :  { %142 = dma.done.wait [#allocation6], 16  }
  0xec   :  { %143 = vsyncadd [#allocation6], 4294967280 }
  0xed   :  { %75 = vsyncpa [#allocation5], 1 }
  0xee   :  { %76 = vsyncpa [#allocation6], 1 }

</bundles_post_ra>
